<compile_context>
chip_gen: v5e
topology: v5e:2x2
jax: 0.10.0
libtpu: 0.0.40
codegen_flags: <defaults>
</compile_context>

<pallas_src>
import jax
import jax.numpy as jnp
from jax.experimental import pallas as pl
from jax.experimental.pallas import tpu as pltpu


def coord_attn_kernel(x_ref, w1_ref, b1_ref, wh_ref, bh_ref, ww_ref, bw_ref, o_ref):
    # x_ref / o_ref: (1, C, H, W) block = one batch element per grid step.
    x = x_ref[0]                                    # (C, H, W), native dtype

    # ---- coordinate pooling (f32 accumulation; outputs are tiny (C,H)/(C,W)) ----
    xf = x.astype(jnp.float32)
    p_h = jnp.mean(xf, axis=2)                      # (C, H): average over W
    p_w = jnp.mean(xf, axis=1)                      # (C, W): average over H

    # ---- shared 1x1 conv (BN pre-folded) + relu(y)*y, torch weight layout (mid, C) ----
    w1 = w1_ref[...].astype(jnp.float32)            # (mid, C)
    b1 = b1_ref[...].astype(jnp.float32)            # (mid, 1)

    def conv1_bn_act(z):                            # z: (C, S) -> (mid, S)
        # Channel mix on VPU/XLU (broadcast-mul + sum over C); MXU skipped on purpose.
        y = jnp.sum(w1[:, :, None] * z[None, :, :], axis=1) + b1
        return jnp.maximum(y, 0.0) * y              # ReLU(y) * y

    y_h = conv1_bn_act(p_h)                         # (mid, H)
    y_w = conv1_bn_act(p_w)                         # (mid, W)

    # ---- per-direction 1x1 convs + sigmoid gates ----
    wh = wh_ref[...].astype(jnp.float32)            # (C, mid)
    bh = bh_ref[...].astype(jnp.float32)            # (C, 1)
    ww = ww_ref[...].astype(jnp.float32)            # (C, mid)
    bw = bw_ref[...].astype(jnp.float32)            # (C, 1, 1)

    # a_h: (C, H)  -- varies along H (sublanes of the output tile)
    a_h = jax.nn.sigmoid(jnp.sum(wh[:, :, None] * y_h[None, :, :], axis=1) + bh)
    # a_w: (C, 1, W) -- computed directly with keepdims so it broadcasts over H
    a_w = jax.nn.sigmoid(
        jnp.sum(ww[:, :, None] * y_w[None, :, :], axis=1, keepdims=True) + bw)

    # ---- gate the input; keep x in its native dtype for the dominant pass ----
    gate = a_h[:, :, None] * a_w                    # (C, H, W), f32
    o_ref[0] = x * gate.astype(x.dtype)


def coord_attn_block(x, conv1_w, conv1_b, bn_gamma, bn_beta, bn_mean, bn_var,
                     convh_w, convh_b, convw_w, convw_b, *, bn_eps=1e-5):
    """x: (B, C, H, W); conv weights in torch layout (out, in, 1, 1); biases (out,)."""
    B, C, H, W = x.shape
    mid = conv1_w.shape[0]
    C_out = convh_w.shape[0]
    assert C_out == C, "final gating multiply requires out_channels == in_channels"

    f32 = jnp.float32
    # Fold eval-mode BatchNorm into the shared 1x1 conv (per mid-channel affine).
    bn_scale = (bn_gamma.astype(f32) / jnp.sqrt(bn_var.astype(f32) + bn_eps))     # (mid,)
    w1f = conv1_w.reshape(mid, C).astype(f32) * bn_scale[:, None]                 # (mid, C)
    b1f = ((conv1_b.astype(f32) - bn_mean.astype(f32)) * bn_scale
           + bn_beta.astype(f32)).reshape(mid, 1)                                 # (mid, 1)

    wh = convh_w.reshape(C_out, mid).astype(f32)                                  # (C, mid)
    bh = convh_b.reshape(C_out, 1).astype(f32)                                    # (C, 1)
    ww = convw_w.reshape(C_out, mid).astype(f32)                                  # (C, mid)
    bw = convw_b.reshape(C_out, 1, 1).astype(f32)                                 # (C, 1, 1)

    return pl.pallas_call(
        coord_attn_kernel,
        out_shape=jax.ShapeDtypeStruct((B, C, H, W), x.dtype),
        grid=(B,),
        in_specs=[
            # one batch element per step; pipelined (double-buffered) over the grid
            pl.BlockSpec((1, C, H, W), lambda b: (b, 0, 0, 0)),
            # parameters: constant block index -> stay VMEM-resident across steps
            pl.BlockSpec((mid, C), lambda b: (0, 0)),
            pl.BlockSpec((mid, 1), lambda b: (0, 0)),
            pl.BlockSpec((C_out, mid), lambda b: (0, 0)),
            pl.BlockSpec((C_out, 1), lambda b: (0, 0)),
            pl.BlockSpec((C_out, mid), lambda b: (0, 0)),
            pl.BlockSpec((C_out, 1, 1), lambda b: (0, 0, 0)),
        ],
        out_specs=pl.BlockSpec((1, C, H, W), lambda b: (b, 0, 0, 0)),
        compiler_params=pltpu.CompilerParams(
            # Independent batch axis: enables DMA/compute overlap and, on v7x,
            # sharding of the batch loop across both TensorCores.
            dimension_semantics=("parallel",),
            # Explicit scoped-VMEM cap, conservative enough for v7x's 64 MiB VMEM
            # (per-step working set here is only a few tens of KiB anyway).
            vmem_limit_bytes=32 * 1024 * 1024,
        ),
    )(x, w1f, b1f, wh, bh, ww, bw)


def coord_attn_ref(x, conv1_w, conv1_b, bn_gamma, bn_beta, bn_mean, bn_var, bn_eps,
                   convh_w, convh_b, convw_w, convw_b):
    """Pure-JAX mirror of the PyTorch forward (eval-mode BN)."""
    B, C, H, W = x.shape
    mid = conv1_w.shape[0]
    C_out = convh_w.shape[0]
    xf = x.astype(jnp.float32)

    x_h = jnp.mean(xf, axis=3)                                        # (B, C, H)
    x_w = jnp.mean(xf, axis=2)                                        # (B, C, W)
    y = jnp.concatenate([x_h, x_w], axis=2)                           # (B, C, H+W)

    y = jnp.einsum('mc,bcs->bms', conv1_w.reshape(mid, C), y) + conv1_b[None, :, None]
    y = (y - bn_mean[None, :, None]) / jnp.sqrt(bn_var[None, :, None] + bn_eps)
    y = y * bn_gamma[None, :, None] + bn_beta[None, :, None]
    y = jnp.maximum(y, 0.0) * y                                       # relu(y) * y

    y_h = y[:, :, :H]                                                 # (B, mid, H)
    y_w = y[:, :, H:]                                                 # (B, mid, W)
    a_h = jax.nn.sigmoid(jnp.einsum('om,bmh->boh', convh_w.reshape(C_out, mid), y_h)
                         + convh_b[None, :, None])                    # (B, C, H)
    a_w = jax.nn.sigmoid(jnp.einsum('om,bmw->bow', convw_w.reshape(C_out, mid), y_w)
                         + convw_b[None, :, None])                    # (B, C, W)

    out = xf * a_w[:, :, None, :] * a_h[:, :, :, None]
    return out.astype(x.dtype)


if __name__ == "__main__":
    B, C, H, W = 2, 4, 16, 16
    reduction = 32
    mid = max(8, C // reduction)            # = 8, as in the PyTorch module
    C_out = C

    key = jax.random.PRNGKey(0)
    ks = jax.random.split(key, 11)

    x        = jax.random.normal(ks[0], (B, C, H, W), dtype=jnp.float32)
    conv1_w  = jax.random.normal(ks[1], (mid, C, 1, 1), jnp.float32) * 0.5
    conv1_b  = jax.random.normal(ks[2], (mid,), jnp.float32) * 0.1
    bn_gamma = 1.0 + 0.1 * jax.random.normal(ks[3], (mid,), jnp.float32)
    bn_beta  = 0.1 * jax.random.normal(ks[4], (mid,), jnp.float32)
    bn_mean  = 0.1 * jax.random.normal(ks[5], (mid,), jnp.float32)
    bn_var   = jnp.abs(jax.random.normal(ks[6], (mid,), jnp.float32)) + 0.5
    convh_w  = jax.random.normal(ks[7], (C_out, mid, 1, 1), jnp.float32) * 0.3
    convh_b  = jax.random.normal(ks[8], (C_out,), jnp.float32) * 0.1
    convw_w  = jax.random.normal(ks[9], (C_out, mid, 1, 1), jnp.float32) * 0.3
    convw_b  = jax.random.normal(ks[10], (C_out,), jnp.float32) * 0.1

    out = jax.block_until_ready(coord_attn_block(
        x, conv1_w, conv1_b, bn_gamma, bn_beta, bn_mean, bn_var,
        convh_w, convh_b, convw_w, convw_b))

    ref = coord_attn_ref(x, conv1_w, conv1_b, bn_gamma, bn_beta, bn_mean, bn_var, 1e-5,
                         convh_w, convh_b, convw_w, convw_b)

    assert out.shape == (B, C, H, W)
    assert jnp.allclose(out, ref, atol=2e-5, rtol=2e-5), "mismatch vs reference"
    print("KERNEL_OK")
</pallas_src>

<mosaic_0001>
module attributes {stable_mosaic.version = 11 : i64} {
  func.func @coord_attn_kernel(%arg0: i32, %arg1: memref<1x4x16x16xf32, #tpu.memory_space<vmem>>, %arg2: memref<8x4xf32, #tpu.memory_space<vmem>>, %arg3: memref<8x1xf32, #tpu.memory_space<vmem>>, %arg4: memref<4x8xf32, #tpu.memory_space<vmem>>, %arg5: memref<4x1xf32, #tpu.memory_space<vmem>>, %arg6: memref<4x8xf32, #tpu.memory_space<vmem>>, %arg7: memref<4x1x1xf32, #tpu.memory_space<vmem>>, %arg8: memref<1x4x16x16xf32, #tpu.memory_space<vmem>>) attributes {dimension_semantics = [#tpu.dimension_semantics<parallel>], iteration_bounds = array<i64: 2>, scalar_prefetch = 0 : i64, scratch_operands = 0 : i64, tpu.core_type = #tpu.core_type<tc>, window_params = [{transform_indices = @transform_0, window_bounds = array<i64: 1, 4, 16, 16>}, {pipeline_mode = #tpu.pipeline_mode<synchronous>, transform_indices = @transform_1, window_bounds = array<i64: 8, 4>}, {pipeline_mode = #tpu.pipeline_mode<synchronous>, transform_indices = @transform_2, window_bounds = array<i64: 8, 1>}, {pipeline_mode = #tpu.pipeline_mode<synchronous>, transform_indices = @transform_3, window_bounds = array<i64: 4, 8>}, {pipeline_mode = #tpu.pipeline_mode<synchronous>, transform_indices = @transform_4, window_bounds = array<i64: 4, 1>}, {pipeline_mode = #tpu.pipeline_mode<synchronous>, transform_indices = @transform_5, window_bounds = array<i64: 4, 8>}, {pipeline_mode = #tpu.pipeline_mode<synchronous>, transform_indices = @transform_6, window_bounds = array<i64: 4, 1, 1>}, {transform_indices = @transform_7, window_bounds = array<i64: 1, 4, 16, 16>}]} {
    %c0 = arith.constant 0 : index
    %c0_0 = arith.constant 0 : index
    %c0_1 = arith.constant 0 : index
    %c0_2 = arith.constant 0 : index
    %0 = vector.load %arg1[%c0, %c0_0, %c0_1, %c0_2] : memref<1x4x16x16xf32, #tpu.memory_space<vmem>>, vector<1x4x16x16xf32>
    %1 = vector.shape_cast %0 : vector<1x4x16x16xf32> to vector<4x16x16xf32>
    %cst = arith.constant dense<0.000000e+00> : vector<4x16xf32>
    %2 = vector.multi_reduction <add>, %1, %cst [2] : vector<4x16x16xf32> to vector<4x16xf32>
    %cst_3 = arith.constant 1.600000e+01 : f32
    %3 = vector.broadcast %cst_3 : f32 to vector<4x16xf32>
    %4 = arith.divf %2, %3 : vector<4x16xf32>
    %cst_4 = arith.constant dense<0.000000e+00> : vector<4x16xf32>
    %5 = vector.multi_reduction <add>, %1, %cst_4 [1] : vector<4x16x16xf32> to vector<4x16xf32>
    %cst_5 = arith.constant 1.600000e+01 : f32
    %6 = vector.broadcast %cst_5 : f32 to vector<4x16xf32>
    %7 = arith.divf %5, %6 : vector<4x16xf32>
    %c0_6 = arith.constant 0 : index
    %c0_7 = arith.constant 0 : index
    %8 = vector.load %arg2[%c0_6, %c0_7] : memref<8x4xf32, #tpu.memory_space<vmem>>, vector<8x4xf32>
    %c0_8 = arith.constant 0 : index
    %c0_9 = arith.constant 0 : index
    %9 = vector.load %arg3[%c0_8, %c0_9] : memref<8x1xf32, #tpu.memory_space<vmem>>, vector<8x1xf32>
    %10 = vector.shape_cast %8 : vector<8x4xf32> to vector<8x4x1xf32>
    %11 = vector.shape_cast %4 : vector<4x16xf32> to vector<1x4x16xf32>
    %12 = vector.broadcast %10 : vector<8x4x1xf32> to vector<8x4x16xf32>
    %13 = vector.broadcast %11 : vector<1x4x16xf32> to vector<8x4x16xf32>
    %14 = arith.mulf %12, %13 : vector<8x4x16xf32>
    %cst_10 = arith.constant dense<0.000000e+00> : vector<8x16xf32>
    %15 = vector.multi_reduction <add>, %14, %cst_10 [1] : vector<8x4x16xf32> to vector<8x16xf32>
    %16 = vector.broadcast %9 : vector<8x1xf32> to vector<8x16xf32>
    %17 = arith.addf %15, %16 : vector<8x16xf32>
    %cst_11 = arith.constant 0.000000e+00 : f32
    %18 = vector.broadcast %cst_11 : f32 to vector<8x16xf32>
    %19 = arith.maximumf %17, %18 : vector<8x16xf32>
    %20 = arith.mulf %19, %17 : vector<8x16xf32>
    %21 = vector.shape_cast %8 : vector<8x4xf32> to vector<8x4x1xf32>
    %22 = vector.shape_cast %7 : vector<4x16xf32> to vector<1x4x16xf32>
    %23 = vector.broadcast %21 : vector<8x4x1xf32> to vector<8x4x16xf32>
    %24 = vector.broadcast %22 : vector<1x4x16xf32> to vector<8x4x16xf32>
    %25 = arith.mulf %23, %24 : vector<8x4x16xf32>
    %cst_12 = arith.constant dense<0.000000e+00> : vector<8x16xf32>
    %26 = vector.multi_reduction <add>, %25, %cst_12 [1] : vector<8x4x16xf32> to vector<8x16xf32>
    %27 = vector.broadcast %9 : vector<8x1xf32> to vector<8x16xf32>
    %28 = arith.addf %26, %27 : vector<8x16xf32>
    %cst_13 = arith.constant 0.000000e+00 : f32
    %29 = vector.broadcast %cst_13 : f32 to vector<8x16xf32>
    %30 = arith.maximumf %28, %29 : vector<8x16xf32>
    %31 = arith.mulf %30, %28 : vector<8x16xf32>
    %c0_14 = arith.constant 0 : index
    %c0_15 = arith.constant 0 : index
    %32 = vector.load %arg4[%c0_14, %c0_15] : memref<4x8xf32, #tpu.memory_space<vmem>>, vector<4x8xf32>
    %c0_16 = arith.constant 0 : index
    %c0_17 = arith.constant 0 : index
    %33 = vector.load %arg5[%c0_16, %c0_17] : memref<4x1xf32, #tpu.memory_space<vmem>>, vector<4x1xf32>
    %c0_18 = arith.constant 0 : index
    %c0_19 = arith.constant 0 : index
    %34 = vector.load %arg6[%c0_18, %c0_19] : memref<4x8xf32, #tpu.memory_space<vmem>>, vector<4x8xf32>
    %c0_20 = arith.constant 0 : index
    %c0_21 = arith.constant 0 : index
    %c0_22 = arith.constant 0 : index
    %35 = vector.load %arg7[%c0_20, %c0_21, %c0_22] : memref<4x1x1xf32, #tpu.memory_space<vmem>>, vector<4x1x1xf32>
    %36 = vector.shape_cast %32 : vector<4x8xf32> to vector<4x8x1xf32>
    %37 = vector.shape_cast %20 : vector<8x16xf32> to vector<1x8x16xf32>
    %38 = vector.broadcast %36 : vector<4x8x1xf32> to vector<4x8x16xf32>
    %39 = vector.broadcast %37 : vector<1x8x16xf32> to vector<4x8x16xf32>
    %40 = arith.mulf %38, %39 : vector<4x8x16xf32>
    %cst_23 = arith.constant dense<0.000000e+00> : vector<4x16xf32>
    %41 = vector.multi_reduction <add>, %40, %cst_23 [1] : vector<4x8x16xf32> to vector<4x16xf32>
    %42 = vector.broadcast %33 : vector<4x1xf32> to vector<4x16xf32>
    %43 = arith.addf %41, %42 : vector<4x16xf32>
    %44 = arith.negf %43 : vector<4x16xf32>
    %45 = math.exp %44 : vector<4x16xf32>
    %cst_24 = arith.constant 1.000000e+00 : f32
    %46 = vector.broadcast %cst_24 : f32 to vector<4x16xf32>
    %47 = arith.addf %46, %45 : vector<4x16xf32>
    %48 = arith.divf %46, %47 : vector<4x16xf32>
    %49 = vector.shape_cast %34 : vector<4x8xf32> to vector<4x8x1xf32>
    %50 = vector.shape_cast %31 : vector<8x16xf32> to vector<1x8x16xf32>
    %51 = vector.broadcast %49 : vector<4x8x1xf32> to vector<4x8x16xf32>
    %52 = vector.broadcast %50 : vector<1x8x16xf32> to vector<4x8x16xf32>
    %53 = arith.mulf %51, %52 : vector<4x8x16xf32>
    %cst_25 = arith.constant dense<0.000000e+00> : vector<4x16xf32>
    %54 = vector.multi_reduction <add>, %53, %cst_25 [1] : vector<4x8x16xf32> to vector<4x16xf32>
    %55 = vector.shape_cast %54 : vector<4x16xf32> to vector<4x1x16xf32>
    %56 = vector.broadcast %35 : vector<4x1x1xf32> to vector<4x1x16xf32>
    %57 = arith.addf %55, %56 : vector<4x1x16xf32>
    %58 = arith.negf %57 : vector<4x1x16xf32>
    %59 = math.exp %58 : vector<4x1x16xf32>
    %cst_26 = arith.constant 1.000000e+00 : f32
    %60 = vector.broadcast %cst_26 : f32 to vector<4x1x16xf32>
    %61 = arith.addf %60, %59 : vector<4x1x16xf32>
    %62 = arith.divf %60, %61 : vector<4x1x16xf32>
    %63 = vector.shape_cast %48 : vector<4x16xf32> to vector<4x16x1xf32>
    %64 = vector.broadcast %63 : vector<4x16x1xf32> to vector<4x16x16xf32>
    %65 = vector.broadcast %62 : vector<4x1x16xf32> to vector<4x16x16xf32>
    %66 = arith.mulf %64, %65 : vector<4x16x16xf32>
    %67 = arith.mulf %1, %66 : vector<4x16x16xf32>
    %c0_27 = arith.constant 0 : index
    %c0_28 = arith.constant 0 : index
    %c0_29 = arith.constant 0 : index
    %c0_30 = arith.constant 0 : index
    %68 = vector.load %arg8[%c0_27, %c0_28, %c0_29, %c0_30] : memref<1x4x16x16xf32, #tpu.memory_space<vmem>>, vector<1x4x16x16xf32>
    %69 = vector.shape_cast %68 : vector<1x4x16x16xf32> to vector<4x16x16xf32>
    %70 = vector.shape_cast %67 : vector<4x16x16xf32> to vector<1x4x16x16xf32>
    tpu.vector_store %arg8[%c0_27, %c0_28, %c0_29, %c0_30], %70 {strides = array<i32>} : memref<1x4x16x16xf32, #tpu.memory_space<vmem>>, vector<1x4x16x16xf32>,
    return
  }
  func.func @transform_0(%arg0: i32) -> (i32, i32, i32, i32) {
    %c0_i32 = arith.constant 0 : i32
    %c0_i32_0 = arith.constant 0 : i32
    %c0_i32_1 = arith.constant 0 : i32
    %c0_i32_2 = arith.constant 0 : i32
    return %arg0, %c0_i32, %c0_i32_0, %c0_i32_1 : i32, i32, i32, i32
  }
  func.func @transform_1(%arg0: i32) -> (i32, i32) {
    %c0_i32 = arith.constant 0 : i32
    %c0_i32_0 = arith.constant 0 : i32
    %c0_i32_1 = arith.constant 0 : i32
    return %c0_i32, %c0_i32_0 : i32, i32
  }
  func.func @transform_2(%arg0: i32) -> (i32, i32) {
    %c0_i32 = arith.constant 0 : i32
    %c0_i32_0 = arith.constant 0 : i32
    %c0_i32_1 = arith.constant 0 : i32
    return %c0_i32, %c0_i32_0 : i32, i32
  }
  func.func @transform_3(%arg0: i32) -> (i32, i32) {
    %c0_i32 = arith.constant 0 : i32
    %c0_i32_0 = arith.constant 0 : i32
    %c0_i32_1 = arith.constant 0 : i32
    return %c0_i32, %c0_i32_0 : i32, i32
  }
  func.func @transform_4(%arg0: i32) -> (i32, i32) {
    %c0_i32 = arith.constant 0 : i32
    %c0_i32_0 = arith.constant 0 : i32
    %c0_i32_1 = arith.constant 0 : i32
    return %c0_i32, %c0_i32_0 : i32, i32
  }
  func.func @transform_5(%arg0: i32) -> (i32, i32) {
    %c0_i32 = arith.constant 0 : i32
    %c0_i32_0 = arith.constant 0 : i32
    %c0_i32_1 = arith.constant 0 : i32
    return %c0_i32, %c0_i32_0 : i32, i32
  }
  func.func @transform_6(%arg0: i32) -> (i32, i32, i32) {
    %c0_i32 = arith.constant 0 : i32
    %c0_i32_0 = arith.constant 0 : i32
    %c0_i32_1 = arith.constant 0 : i32
    %c0_i32_2 = arith.constant 0 : i32
    return %c0_i32, %c0_i32_0, %c0_i32_1 : i32, i32, i32
  }
  func.func @transform_7(%arg0: i32) -> (i32, i32, i32, i32) {
    %c0_i32 = arith.constant 0 : i32
    %c0_i32_0 = arith.constant 0 : i32
    %c0_i32_1 = arith.constant 0 : i32
    %c0_i32_2 = arith.constant 0 : i32
    return %arg0, %c0_i32, %c0_i32_0, %c0_i32_1 : i32, i32, i32, i32
  }
}

</mosaic_0001>

<bundles_post_ra>
// kernel: tpu_custom_call.1
= control target key start
LH: loop header
LB: loop body
LE: loop exit
PB: predicated region body
PF: predicated region fallthrough
CT: control target
= control target key end

     0   :  { %12 = vsyncpa [#allocation3], 0  ;;  %s1847_s0 = inlined_call_operand.hbm [shape: f32[2,4,16,16], index: 0, kind: input, shape index: {}]   ;;  %s1848_s1 = inlined_call_operand.vmem [shape: f32[8,4], index: 1, kind: input, shape index: {}]   ;;  %s1849_s2 = inlined_call_operand.vmem [shape: f32[8,1], index: 2, kind: input, shape index: {}]   ;;  %s1850_s3 = inlined_call_operand.vmem [shape: f32[4,8], index: 3, kind: input, shape index: {}]   ;;  %s1851_s4 = inlined_call_operand.vmem [shape: f32[4,1], index: 4, kind: input, shape index: {}]   ;;  %s1852_s5 = inlined_call_operand.vmem [shape: f32[4,8], index: 5, kind: input, shape index: {}]   ;;  %s1853_s6 = inlined_call_operand.vmem [shape: f32[4,1,1], index: 6, kind: input, shape index: {}]   ;;  %s1854_s7 = inlined_call_operand.hbm [shape: f32[2,4,16,16], index: 7, kind: output, shape index: {}]  }
   0x1   :  { %14 = vsyncpa [#allocation3 + $0x1], 0 }
   0x2   :  { %15 = vsyncpa [#allocation4], 0 }
   0x3   :  { %17 = vsyncpa [#allocation4 + $0x1], 0  ;;  %s1485_s24 = smov 0   ;;  %s1487_s25 = smov 0  }
   0x4   :  { %s1489_s26 = smov 0   ;;  %s1491_s27 = smov 0  }
   0x5 LB: > { %s1506_s28 = sadd.s32 4294967295, %s1437_s27   ;;  %s1209_s29 = sadd.s32 4294967294, %s1437_s27   ;;  %s1437_s27 = sphi %s1491_s27, %s1866_s27   ;;  %s1433_s26 = sphi %s1489_s26, %s1865_s26   ;;  %s1429_s25 = sphi %s1487_s25, %s1864_s25   ;;  %s1425_s24 = sphi %s1485_s24, %s1863_s24  }
   0x6   : > { %s1510_s30 = sadd.s32 1, %s1437_s27   ;;  %s30_s8 = sadd.s32 1, %s1433_s26 }
   0x7   : > { %s27_s9 = ssub.s32 %s1437_s27, %s1510_s30  ;;  %p37_p0 = scmp.ne.s32.totalorder %s1433_s26, %s1429_s25 }
   0x8   : > { %p28_p1 = scmp.eq.s32.totalorder %s27_s9, 0  ;;  %p38_p2 = scmp.eq.s32.totalorder %s1437_s27, 0 }
   0x9   : > { %p43_p3 = scmp.ne.s32.totalorder %s1429_s25, %s1425_s24  ;;  %p44_p4 = scmp.eq.s32.totalorder %s1506_s28, 0 }
   0xa   : > { %s1522_s10 = scalar_select %p28_p1, %s1433_s26, %s30_s8  }
   0xb   : > { %p1524_p5 = por %p38_p2, %p37_p0  ;;  %p1528_p6 = por %p44_p4, %p43_p3 }
   0xc   : > { %1855 = sst [smem:[#allocation8_spill]] %s1522_s10  ;;  %p193_p7 = scmp.eq.s32.totalorder %s1506_s28, 1 }
   0xd   : > { %p199_p8 = scmp.eq.s32.totalorder %s1209_s29, 1  ;;  %p1245_p10 = scmp.lt.s32.totalorder %s1437_s27, 2 }
   0xe   : > { %p1535_p11 = por %p193_p7, %p37_p0  ;;  %s237_s15 = sand.u32 1, %s1433_s26  }
   0xf   : > { %p1539_p12 = por %p199_p8, %p43_p3  ;;  %s1231_s16 = sshll.u32 %s1437_s27, 6 }
  0x10   : > { %s1212_s17 = sshll.u32 %s237_s15, 6  ;;  %s246_s20 = scalar_lea.hbm %s1847_s0, %s1231_s16 }
  0x11   : > { %s247_s21 = sshll.u32 %s246_s20, 4  ;;  %s241_s22 = scalar_lea.vmem [#allocation2], %s1212_s17  ;;  %s248_s21 = int_to_ptr.hbm [resolvable:$true] %s247_s21 }
  0x12   : > { %s249_s23 = sshll.u32 %s241_s22, 4  ;;  %p1550_p13 = pnand %p1245_p10, %p1524_p5  ;;  %s250_s23 = int_to_ptr.vmem [resolvable:$true] %s249_s23 }
  0x13   : > { %p1215_p0 = scmp.ge.s32.totalorder %s1437_s27, 1  ;;  %p257_p1 = scmp.lt.s32.totalorder %s1437_s27, 3 }
  0x14   : > { %s238_s8 = scalar_lea.sflag [#allocation3], %s237_s15  ;;  %s1341_s9 = sshra.s32 %s248_s21, 4  ;;  %s1342_s9 = int_to_ptr.hbm [resolvable:$true] %s1341_s9 }
  0x15   : > { %s1343_s10 = scalar_lea.hbm %s1342_s9, 64  ;;  %p1345_p3 = pneg %p1550_p13 }
  0x16   : > { %p1344_p2 = scmp.ne.s32.totalorder %s1342_s9, %s1343_s10  ;;  %s1348_s11 = scalar_lea.hbm %s1847_s0, 128 }
  0x17   : > { %p1349_p5 = scmp.lt.s32.totalorder %s1342_s9, %s1847_s0  ;;  %p1350_p8 = scmp.lt.s32.totalorder %s1348_s11, %s1343_s10 }
  0x18   : > { %p1346_p4 = pnand %p1345_p3, %p1344_p2 }
  0x19   : > { %p1351_p10 = por %p1350_p8, %p1349_p5 }
  0x1a   : > { %p1347_p7 = pneg %p1346_p4 }
  0x1c   : > { %p1352_p9 = pnand %p1351_p10, %p1347_p7 }
  0x1e   : > { %1355 = shalt.err (!%p1352_p9)
}
  0x1f   : > { %s1439_s15 = smov 128   ;;  %s1440_s20 = smov 8  }
  0x20   : > { %1240 = dma.hbm_to_vmem [thread:$0]  (!%p1550_p13), %s248_s21, 1024, %s250_s23, %s238_s8, %s1439_s15, %s1439_s15, %s1440_s20  }
  0x21   : > { %p258_p2 = pnand %p1215_p0, %p257_p1 }
  0x22   : > { %s1571_s22 = sand.u32 (!%p258_p2), 1, %s1429_s25  }
  0x23   : > { %261 = sbr.rel (%p258_p2) target bundleno = 438 (0x1b6), region = 48  ;;  %s1216_s10 = sshll.u32 (!%p258_p2), %s1571_s22, 6 }
  0x24   : > { %s264_s9 = scalar_lea.sflag (!%p258_p2), [#allocation3], %s1571_s22  ;;  %s1577_s16 = scalar_lea.vmem (!%p258_p2), [#allocation2], %s1216_s10 }
  0x28   : > { %1416 = dma.done.wait (%p1528_p6), %s264_s9, 1024  }
  0x29   : > { %1418 = vsyncadd (%p1528_p6), %s264_s9, 4294966272  ;;  %v382_v0 = vlaneseq  ;;  %vm307_vm0 = vcmask 130048   ;;  %v303_v2 = vld [vmem:[%s1577_s16 + $0x20] sm:$0xff]  ;;  %v301_v3 = vld [vmem:[%s1577_s16 + $0x10] sm:$0xff]  ;;  %v1441_v29 = vmov 0   ;;  %v1442_v40 = vmov 16.0  }
  0x2a   : > { %v299_v4 = vld [vmem:[%s1577_s16] sm:$0xff]  ;;  %v320_v5 = vsel %vm307_vm0, %v303_v2, 0.0  ;;  %v314_v6 = vsel %vm307_vm0, %v301_v3, 0.0  ;;  %v304_v8 = vld [vmem:[%s1577_s16 + $0x28] sm:$0xff]  ;;  %v302_v9 = vld [vmem:[%s1577_s16 + $0x18] sm:$0xff]  ;;  %1299 = vrcp.f32 %v1442_v40  ;;  %vm461_vm2 = vcmask 1041409  }
  0x2b   : > { %v1584_v1 = vshrl.u32 %v382_v0, 7  ;;  %v308_v7 = vsel %vm307_vm0, %v299_v4, 0.0  ;;  %321 = vadd.xlane.f32.xlu2 %v320_v5  ;;  %315 = vadd.xlane.f32.xlu1 %v314_v6  ;;  %v323_v10 = vsel %vm307_vm0, %v304_v8, 0.0  ;;  %v317_v11 = vsel %vm307_vm0, %v302_v9, 0.0  ;;  %v300_v12 = vld [vmem:[%s1577_s16 + $0x8] sm:$0xff]  ;;  %v306_v13 = vld [vmem:[%s1577_s16 + $0x38] sm:$0xff] }
  0x2c   : > { %v305_v14 = vld [vmem:[%s1577_s16 + $0x30] sm:$0xff]  ;;  %309 = vadd.xlane.f32.xlu0 %v308_v7  ;;  %v361_v15 = vadd.f32 %v323_v10, %v320_v5  ;;  %v354_v16 = vadd.f32 %v317_v11, %v314_v6  ;;  %v311_v17 = vsel %vm307_vm0, %v300_v12, 0.0  ;;  %v329_v19 = vsel %vm307_vm0, %v306_v13, 0.0  ;;  %v379_v22 = vld [vmem:[%s1848_s1] sm:$0xff]  ;;  %s1784_s11 = scalar_lea.vmem [#allocation5], %s1216_s10  ;;  %s1232_s10 = sshll.u32 %s1506_s28, 6 }
  0x2d   : > { %1285 = vset.pattern.permute.xlu2 %v1584_v1  ;;  %1286 = vset.pattern.permute.xlu0 %v1584_v1  ;;  %v347_v18 = vadd.f32 %v311_v17, %v308_v7  ;;  %v326_v20 = vsel %vm307_vm0, %v305_v14, 0.0  ;;  %v381_v23 = vperm.slane %v379_v22, 0  ;;  %v388_v24 = vperm.slane %v379_v22, 1  ;;  %v380_v27 = vld [vmem:[%s1849_s2] sm:$0xff]  ;;  %s1132_s15 = scalar_lea.hbm %s1854_s7, %s1232_s10  ;;  %s1133_s20 = sshll.u32 %s1784_s11, 4  ;;  %s1134_s20 = int_to_ptr.vmem [resolvable:$true] %s1133_s20 }
  0x2e   : > { %1287 = vset.pattern.permute.xlu1 %v1584_v1  ;;  %v368_v21 = vadd.f32 %v329_v19, %v326_v20  ;;  %v402_v25 = vperm.slane %v379_v22, 3  ;;  %v395_v26 = vperm.slane %v379_v22, 2  ;;  %v409_v28 = vperm.slane %v379_v22, 4  ;;  %v673_v31 = vld [vmem:[%s1851_s4] sm:$0xf]  ;;  %s1135_s9 = sshll.u32 %s1132_s15, 4  ;;  %s1136_s9 = int_to_ptr.hbm [resolvable:$true] %s1135_s9 }
  0x2f   : > { %v416_v30 = vperm.slane %v379_v22, 5  ;;  %v423_v32 = vperm.slane %v379_v22, 6  ;;  %v430_v33 = vperm.slane %v379_v22, 7  ;;  %v672_v34 = vld [vmem:[%s1850_s3] sm:$0xf]  ;;  %v355_v42 = vrot.slane %v354_v16, 4 }
  0x30   : > { %v679_v35 = vperm.slane %v672_v34, 0  ;;  %v686_v36 = vperm.slane %v672_v34, 1  ;;  %v674_v37 = vld [vmem:[%s1852_s5] sm:$0xf]  ;;  %v693_v39 = vperm.slane %v672_v34, 2  ;;  %v700_v41 = vperm.slane %v672_v34, 3  ;;  %v1300_v46 = vpop.eup %1299 }
  0x31   : > { %v871_v38 = vperm.slane %v674_v37, 2  ;;  %v348_v43 = vrot.slane %v347_v18, 4  ;;  %v362_v44 = vrot.slane %v361_v15, 4  ;;  %v369_v45 = vrot.slane %v368_v21, 4  ;;  %v678_v51 = vld [vmem:[%s1853_s6 + $0x3] sm:$0x1] }
  0x32   : > { %v356_v47 = vadd.f32 %v355_v42, %v354_v16  ;;  %v857_v50 = vperm.slane %v674_v37, 0  ;;  %v864_v53 = vperm.slane %v674_v37, 1  ;;  %v333_v54 = vmul.f32 16.0, %v1300_v46  ;;  %v675_v6 = vld [vmem:[%s1853_s6] sm:$0x1]  ;;  %s1121_s12 = scalar_lea.sflag [#allocation4], %s1571_s22 }
  0x33   : > { %324 = vadd.xlane.f32.xlu2 %v323_v10  ;;  %318 = vadd.xlane.f32.xlu1 %v317_v11  ;;  %v349_v48 = vadd.f32 %v348_v43, %v347_v18  ;;  %v363_v49 = vadd.f32 %v362_v44, %v361_v15  ;;  %v370_v52 = vadd.f32 %v369_v45, %v368_v21  ;;  %v878_v63 = vperm.slane %v674_v37, 3  ;;  %v676_v15 = vld [vmem:[%s1853_s6 + $0x1] sm:$0x1]  ;;  %v677_v18 = vld [vmem:[%s1853_s6 + $0x2] sm:$0x1]  ;;  %s1385_s21 = sshra.s32 %s1136_s9, 4  ;;  %s1386_s21 = int_to_ptr.hbm [resolvable:$true] %s1385_s21 }
  0x34   : > { %312 = vadd.xlane.f32.xlu0 %v311_v17  ;;  %v357_v55 = vrot.slane %v356_v47, 2  ;;  %v334_v59 = vsub.f32 1.0, %v333_v54  ;;  %vm337_vm1 = vweird.f32 %v1300_v46  ;;  %vm463_vm3 = vcmask 1042434   ;;  %s1387_s23 = scalar_lea.hbm %s1386_s21, 64  ;;  %s1391_s8 = scalar_lea.hbm %s1854_s7, 128 }
  0x35   : > { %v350_v56 = vrot.slane %v349_v48, 2  ;;  %v364_v57 = vrot.slane %v363_v49, 2  ;;  %v371_v58 = vrot.slane %v370_v52, 2  ;;  %vm465_vm4 = vcmask 1043459   ;;  %p1388_p6 = scmp.ne.s32.totalorder %s1386_s21, %s1387_s23  ;;  %p1392_p0 = scmp.lt.s32.totalorder %s1386_s21, %s1854_s7 }
  0x36   : > { %v358_v60 = vadd.f32 %v357_v55, %v356_v47  ;;  %v335_v3 = vmul.f32 %v1300_v46, %v334_v59  ;;  %vm450_vm5 = vcmask 130112   ;;  %vm476_vm6 = vcmask 125952   ;;  %p1393_p1 = scmp.lt.s32.totalorder %s1391_s8, %s1387_s23 }
  0x37   : > { %v351_v61 = vadd.f32 %v350_v56, %v349_v48  ;;  %v365_v62 = vadd.f32 %v364_v57, %v363_v49  ;;  %v372_v2 = vadd.f32 %v371_v58, %v370_v52  ;;  %vm722_vm7 = vcmask 1044484   ;;  %p1389_p9 = pnand %p1388_p6, %p1535_p11 }
  0x38   : > { %v359_v4 = vrot.slane %v358_v60, 1  ;;  %v336_v9 = vadd.f32 %v1300_v46, %v335_v3  ;;  %vm725_vm8 = vcmask 1045509   ;;  %vm728_vm9 = vcmask 1046534   ;;  %p1394_p3 = por %p1393_p1, %p1392_p0 }
  0x39   : > { %v352_v5 = vrot.slane %v351_v61, 1  ;;  %v366_v7 = vrot.slane %v365_v62, 1  ;;  %v373_v8 = vrot.slane %v372_v2, 1  ;;  %vm731_vm10 = vcmask 1047559   ;;  %p1390_p13 = pneg %p1389_p9 }
  0x3a   : > { %v360_v10 = vadd.f32 %v359_v4, %v358_v60  ;;  %v338_v14 = vsel %vm337_vm1, %v1300_v46, %v336_v9 }
  0x3b   : > { %330 = vadd.xlane.f32.xlu1 %v329_v19  ;;  %v353_v11 = vadd.f32 %v352_v5, %v351_v61  ;;  %v367_v12 = vadd.f32 %v366_v7, %v365_v62  ;;  %v374_v13 = vadd.f32 %v373_v8, %v372_v2  ;;  %p1395_p4 = pnand %p1394_p3, %p1390_p13 }
  0x3c   : > { %327 = vadd.xlane.f32.xlu0 %v326_v20  ;;  %v376_v16 = vmul.f32 %v360_v10, %v338_v14 }
  0x3d   : > { %v375_v17 = vmul.f32 %v353_v11, %v338_v14  ;;  %v377_v19 = vmul.f32 %v367_v12, %v338_v14  ;;  %v378_v20 = vmul.f32 %v374_v13, %v338_v14 }
  0x3f   : > { %v580_v21 = vsel %vm461_vm2, %v376_v16, %v375_v17 }
  0x40   : > { %v581_v22 = vsel %vm463_vm3, %v377_v19, %v580_v21 }
  0x4b   : > { %386 = vperm.xlu2 %1285, %v381_v23   ;;  %v1641_v23 = vsel %vm465_vm4, %v378_v20, %v581_v22 }
  0x50   : > { %393 = vperm.xlu0 %1286, %v388_v24  }
  0x53   : > { %407 = vperm.xlu2 %1285, %v402_v25  }
  0x54   : > { %400 = vperm.xlu1 %1287, %v395_v26  }
  0x58   : > { %1288 = vset.pattern.permute.xlu0 %v1441_v29 }
  0x59   : > { %535 = vperm.xlu0 %1288, %v380_v27   ;;  %v446_v27 = vand.u32 127, %v382_v0 }
  0x5b   : > { %414 = vperm.xlu2 %1285, %v409_v28  }
  0x5c   : > { %421 = vperm.xlu1 %1287, %v416_v30  }
  0x61   : > { %768 = vperm.xlu0 %1288, %v673_v31  }
  0x63   : > { %428 = vperm.xlu2 %1285, %v423_v32  }
  0x64   : > { %435 = vperm.xlu1 %1287, %v430_v33  }
  0x69   : > { %1289 = vset.pattern.permute.xlu0 %v1584_v1 }
  0x6b   : > { %684 = vperm.xlu2 %1285, %v679_v35  }
  0x6c   : > { %691 = vperm.xlu1 %1287, %v686_v36  }
  0x71   : > { %876 = vperm.xlu0 %1289, %v871_v38  }
  0x73   : > { %698 = vperm.xlu2 %1285, %v693_v39  }
  0x74   : > { %705 = vperm.xlu1 %1287, %v700_v41  }
  0x79   : > { %1292 = vset.pattern.permute.xlu0 %v1441_v29 }
  0x7a   : > { %960 = vperm.xlu0 %1292, %v678_v51  }
  0x7b   : > { %862 = vperm.xlu2 %1285, %v857_v50  }
  0x7c   : > { %869 = vperm.xlu1 %1287, %v864_v53  }
  0x82   : > { %1295 = vset.pattern.permute.xlu0 %v1584_v1 }
  0x83   : > { %883 = vperm.xlu2 %1285, %v878_v63  }
  0x84   : > { %1290 = vset.pattern.permute.xlu1 %v1441_v29 }
  0x85   : > { %942 = vperm.xlu1 %1290, %v675_v6  }
  0x8b   : > { %1291 = vset.pattern.permute.xlu2 %v1441_v29  ;;  %v448_v29 = vadd.s32 4294967288, %v446_v27 }
  0x8c   : > { %948 = vperm.xlu2 %1291, %v676_v15  }
  0x8d   : > { %954 = vperm.xlu1 %1290, %v677_v18  }
  0x94   : > { %1293 = vset.pattern.permute.xlu2 %v1584_v1 }
  0x9e   : > { %v322_v24 = vpop.xlane.xlu2 %321  ;;  %v316_v25 = vpop.xlane.xlu1 %315 }
  0x9f   : > { %v310_v26 = vpop.xlane.xlu0 %309  ;;  %v341_v34 = vmul.f32 %v338_v14, %v316_v25  ;;  %v343_v36 = vmul.f32 %v338_v14, %v322_v24 }
  0xa0   : > { %v339_v28 = vmul.f32 %v338_v14, %v310_v26 }
  0xa1   : > { %v452_v41 = vperm.slane %v341_v34, %v446_v27  ;;  %v455_v42 = vperm.slane %v343_v36, %v446_v27 }
  0xa2   : > { %v447_v38 = vperm.slane %v339_v28, %v446_v27 }
  0xa6   : > { %v325_v30 = vpop.xlane.xlu2 %324  ;;  %v319_v31 = vpop.xlane.xlu1 %318 }
  0xa7   : > { %v342_v32 = vmul.f32 %v338_v14, %v319_v31  ;;  %v313_v33 = vpop.xlane.xlu0 %312  ;;  %v344_v37 = vmul.f32 %v338_v14, %v325_v30 }
  0xa8   : > { %v340_v35 = vmul.f32 %v338_v14, %v313_v33 }
  0xa9   : > { %v453_v39 = vperm.slane %v342_v32, %v448_v29  ;;  %v456_v43 = vperm.slane %v344_v37, %v448_v29 }
  0xaa   : > { %v449_v40 = vperm.slane %v340_v35, %v448_v29 }
  0xab   : > { %v454_v44 = vsel %vm450_vm5, %v453_v39, %v452_v41  ;;  %v457_v51 = vsel %vm450_vm5, %v456_v43, %v455_v42 }
  0xac   : > { %v451_v0 = vsel %vm450_vm5, %v449_v40, %v447_v38 }
  0xad   : > { %v462_v52 = vsel %vm461_vm2, %v454_v44, %v451_v0 }
  0xae   : > { %v387_v45 = vpop.permute.xlu2 %386  ;;  %v331_v46 = vpop.xlane.xlu1 %330  ;;  %v464_v56 = vsel %vm463_vm3, %v457_v51, %v462_v52 }
  0xaf   : > { %v584_v47 = vmul.f32 %v1641_v23, %v387_v45  ;;  %v346_v48 = vmul.f32 %v338_v14, %v331_v46  ;;  %v328_v49 = vpop.xlane.xlu0 %327 }
  0xb0   : > { %v345_v50 = vmul.f32 %v338_v14, %v328_v49 }
  0xb1   : > { %v592_v53 = vsel %vm476_vm6, %v584_v47, 0.0  ;;  %v459_v54 = vperm.slane %v346_v48, %v448_v29 }
  0xb2   : > { %v458_v55 = vperm.slane %v345_v50, %v446_v27  ;;  %v593_v58 = vrot.slane %v592_v53, 4 }
  0xb4   : > { %v460_v57 = vsel %vm450_vm5, %v459_v54, %v458_v55  ;;  %v594_v3 = vadd.f32 %v593_v58, %v592_v53 }
  0xb5   : > { %v1654_v59 = vsel %vm465_vm4, %v460_v57, %v464_v56 }
  0xb6   : > { %v468_v60 = vmul.f32 %v1654_v59, %v387_v45  ;;  %v408_v61 = vpop.permute.xlu2 %407  ;;  %v595_v11 = vrot.slane %v594_v3, 2 }
  0xb7   : > { %v471_v62 = vmul.f32 %v1654_v59, %v408_v61  ;;  %v587_v63 = vmul.f32 %v1641_v23, %v408_v61 }
  0xb8   : > { %v477_v2 = vsel %vm476_vm6, %v468_v60, 0.0  ;;  %v596_v18 = vadd.f32 %v595_v11, %v594_v3 }
  0xb9   : > { %v478_v4 = vrot.slane %v477_v2, 4  ;;  %v498_v5 = vsel %vm476_vm6, %v471_v62, 0.0  ;;  %v613_v6 = vsel %vm476_vm6, %v587_v63, 0.0 }
  0xba   : > { %v499_v7 = vrot.slane %v498_v5, 4  ;;  %v614_v8 = vrot.slane %v613_v6, 4  ;;  %v597_v32 = vrot.slane %v596_v18, 1 }
  0xbb   : > { %v479_v9 = vadd.f32 %v478_v4, %v477_v2 }
  0xbc   : > { %v500_v10 = vadd.f32 %v499_v7, %v498_v5  ;;  %v615_v12 = vadd.f32 %v614_v8, %v613_v6  ;;  %v598_v62 = vadd.f32 %v597_v32, %v596_v18 }
  0xbd   : > { %v480_v16 = vrot.slane %v479_v9, 2 }
  0xbe   : > { %v415_v13 = vpop.permute.xlu2 %414  ;;  %v501_v17 = vrot.slane %v500_v10, 2  ;;  %v616_v19 = vrot.slane %v615_v12, 2 }
  0xbf   : > { %v472_v14 = vmul.f32 %v1654_v59, %v415_v13  ;;  %v588_v15 = vmul.f32 %v1641_v23, %v415_v13  ;;  %v481_v31 = vadd.f32 %v480_v16, %v479_v9 }
  0xc0   : > { %v502_v28 = vadd.f32 %v501_v17, %v500_v10  ;;  %v617_v33 = vadd.f32 %v616_v19, %v615_v12 }
  0xc1   : > { %v505_v20 = vsel %vm476_vm6, %v472_v14, 0.0  ;;  %v620_v21 = vsel %vm476_vm6, %v588_v15, 0.0  ;;  %v482_v48 = vrot.slane %v481_v31, 1 }
  0xc2   : > { %v506_v22 = vrot.slane %v505_v20, 4  ;;  %v621_v24 = vrot.slane %v620_v21, 4  ;;  %v394_v25 = vpop.permute.xlu0 %393  ;;  %v503_v45 = vrot.slane %v502_v28, 1  ;;  %v618_v63 = vrot.slane %v617_v33, 1 }
  0xc3   : > { %v469_v26 = vmul.f32 %v1654_v59, %v394_v25  ;;  %v585_v27 = vmul.f32 %v1641_v23, %v394_v25  ;;  %v1680_v12 = vadd.f32 %v482_v48, %v481_v31 }
  0xc4   : > { %v507_v29 = vadd.f32 %v506_v22, %v505_v20  ;;  %v622_v30 = vadd.f32 %v621_v24, %v620_v21  ;;  %v1678_v8 = vadd.f32 %v503_v45, %v502_v28  ;;  %v619_v17 = vadd.f32 %v618_v63, %v617_v33 }
  0xc5   : > { %v484_v34 = vsel %vm476_vm6, %v469_v26, 0.0  ;;  %v599_v35 = vsel %vm476_vm6, %v585_v27, 0.0 }
  0xc6   : > { %v508_v36 = vrot.slane %v507_v29, 2  ;;  %v623_v37 = vrot.slane %v622_v30, 2  ;;  %v485_v38 = vrot.slane %v484_v34, 4  ;;  %v600_v39 = vrot.slane %v599_v35, 4  ;;  %v429_v40 = vpop.permute.xlu2 %428  ;;  %v401_v41 = vpop.permute.xlu1 %400 }
  0xc7   : > { %v474_v42 = vmul.f32 %v1654_v59, %v429_v40  ;;  %v590_v43 = vmul.f32 %v1641_v23, %v429_v40  ;;  %v470_v44 = vmul.f32 %v1654_v59, %v401_v41  ;;  %v586_v0 = vmul.f32 %v1641_v23, %v401_v41 }
  0xc8   : > { %v486_v46 = vadd.f32 %v485_v38, %v484_v34  ;;  %v601_v47 = vadd.f32 %v600_v39, %v599_v35  ;;  %v509_v53 = vadd.f32 %v508_v36, %v507_v29  ;;  %v624_v54 = vadd.f32 %v623_v37, %v622_v30 }
  0xc9   : > { %v519_v49 = vsel %vm476_vm6, %v474_v42, 0.0  ;;  %v634_v50 = vsel %vm476_vm6, %v590_v43, 0.0  ;;  %v491_v51 = vsel %vm476_vm6, %v470_v44, 0.0  ;;  %v606_v52 = vsel %vm476_vm6, %v586_v0, 0.0 }
  0xca   : > { %v487_v55 = vrot.slane %v486_v46, 2  ;;  %v602_v56 = vrot.slane %v601_v47, 2  ;;  %v520_v57 = vrot.slane %v519_v49, 4  ;;  %v635_v58 = vrot.slane %v634_v50, 4 }
  0xcb   : > { %v492_v60 = vrot.slane %v491_v51, 4  ;;  %v607_v61 = vrot.slane %v606_v52, 4  ;;  %v510_v9 = vrot.slane %v509_v53, 1  ;;  %v625_v10 = vrot.slane %v624_v54, 1  ;;  %v1685_v28 = vpop.permute.xlu0 %535 }
  0xcc   : > { %v488_v2 = vadd.f32 %v487_v55, %v486_v46  ;;  %v603_v3 = vadd.f32 %v602_v56, %v601_v47  ;;  %v521_v4 = vadd.f32 %v520_v57, %v519_v49  ;;  %v636_v5 = vadd.f32 %v635_v58, %v634_v50 }
  0xcd   : > { %v493_v6 = vadd.f32 %v492_v60, %v491_v51  ;;  %v608_v7 = vadd.f32 %v607_v61, %v606_v52  ;;  %v1683_v26 = vadd.f32 %v510_v9, %v509_v53  ;;  %v626_v27 = vadd.f32 %v625_v10, %v624_v54 }
  0xce   : > { %v422_v11 = vpop.permute.xlu1 %421  ;;  %v522_v13 = vrot.slane %v521_v4, 2  ;;  %v637_v14 = vrot.slane %v636_v5, 2  ;;  %v489_v18 = vrot.slane %v488_v2, 1  ;;  %v604_v19 = vrot.slane %v603_v3, 1 }
  0xcf   : > { %v494_v15 = vrot.slane %v493_v6, 2  ;;  %v609_v16 = vrot.slane %v608_v7, 2  ;;  %v473_v20 = vmul.f32 %v1654_v59, %v422_v11  ;;  %v589_v30 = vmul.f32 %v1641_v23, %v422_v11 }
  0xd0   : > { %v523_v21 = vadd.f32 %v522_v13, %v521_v4  ;;  %v638_v22 = vadd.f32 %v637_v14, %v636_v5  ;;  %v537_v34 = vrot.slane %v1685_v28, 1  ;;  %v1690_v35 = vadd.f32 %v489_v18, %v488_v2 }
  0xd1   : > { %v495_v24 = vadd.f32 %v494_v15, %v493_v6  ;;  %v610_v25 = vadd.f32 %v609_v16, %v608_v7  ;;  %v512_v29 = vsel %vm476_vm6, %v473_v20, 0.0  ;;  %v538_v36 = vrot.slane %v1685_v28, 2 }
  0xd2   : > { %v524_v31 = vrot.slane %v523_v21, 1  ;;  %v639_v32 = vrot.slane %v638_v22, 1  ;;  %v513_v37 = vrot.slane %v512_v29, 4  ;;  %v627_v38 = vsel %vm476_vm6, %v589_v30, 0.0 }
  0xd3   : > { %v611_v33 = vrot.slane %v610_v25, 1  ;;  %v605_v39 = vadd.f32 %v604_v19, %v603_v3  ;;  %v496_v40 = vrot.slane %v495_v24, 1  ;;  %v541_v41 = vrot.slane %v1685_v28, 5 }
  0xd4   : > { %v543_v42 = vrot.slane %v1685_v28, 7  ;;  %v1696_v43 = vadd.f32 %v524_v31, %v523_v21  ;;  %v640_v44 = vadd.f32 %v639_v32, %v638_v22  ;;  %v514_v0 = vadd.f32 %v513_v37, %v512_v29 }
  0xd5   : > { %v628_v45 = vrot.slane %v627_v38, 4  ;;  %v612_v47 = vadd.f32 %v611_v33, %v610_v25  ;;  %v539_v50 = vrot.slane %v1685_v28, 3  ;;  %v540_v53 = vrot.slane %v1685_v28, 4 }
  0xd6   : > { %v436_v46 = vpop.permute.xlu1 %435  ;;  %v515_v51 = vrot.slane %v514_v0, 2  ;;  %v542_v54 = vrot.slane %v1685_v28, 6  ;;  %v648_v57 = vadd.f32 %v598_v62, %v1685_v28  ;;  %v649_v58 = vadd.f32 %v605_v39, %v537_v34 }
  0xd7   : > { %v475_v48 = vmul.f32 %v1654_v59, %v436_v46  ;;  %v591_v49 = vmul.f32 %v1641_v23, %v436_v46  ;;  %v629_v52 = vadd.f32 %v628_v45, %v627_v38  ;;  %v650_v63 = vadd.f32 %v612_v47, %v538_v36 }
  0xd8   : > { %v516_v59 = vadd.f32 %v515_v51, %v514_v0  ;;  %v651_v2 = vadd.f32 %v619_v17, %v539_v50  ;;  %v652_v3 = vadd.f32 %v626_v27, %v540_v53  ;;  %v654_v4 = vadd.f32 %v640_v44, %v542_v54 }
  0xd9   : > { %v526_v55 = vsel %vm476_vm6, %v475_v48, 0.0  ;;  %v641_v56 = vsel %vm476_vm6, %v591_v49, 0.0  ;;  %v630_v60 = vrot.slane %v629_v52, 2  ;;  %v497_v9 = vadd.f32 %v496_v40, %v495_v24 }
  0xda   : > { %v527_v23 = vrot.slane %v526_v55, 4  ;;  %v642_v61 = vrot.slane %v641_v56, 4  ;;  %v517_v62 = vrot.slane %v516_v59, 1  ;;  %v657_v10 = vmax.f32 %v649_v58, 0.0 }
  0xdb   : > { %v631_v5 = vadd.f32 %v630_v60, %v629_v52  ;;  %v658_v11 = vmax.f32 %v650_v63, 0.0  ;;  %v659_v13 = vmax.f32 %v651_v2, 0.0  ;;  %v656_v17 = vmax.f32 %v648_v57, 0.0 }
  0xdc   : > { %v528_v6 = vadd.f32 %v527_v23, %v526_v55  ;;  %v643_v7 = vadd.f32 %v642_v61, %v641_v56  ;;  %v518_v14 = vadd.f32 %v517_v62, %v516_v59  ;;  %v660_v19 = vmax.f32 %v652_v3, 0.0 }
  0xdd   : > { %v632_v15 = vrot.slane %v631_v5, 1  ;;  %v662_v20 = vmax.f32 %v654_v4, 0.0  ;;  %v665_v21 = vmul.f32 %v657_v10, %v649_v58  ;;  %v666_v30 = vmul.f32 %v658_v11, %v650_v63 }
  0xde   : > { %v529_v16 = vrot.slane %v528_v6, 2  ;;  %v644_v18 = vrot.slane %v643_v7, 2  ;;  %v557_v22 = vadd.f32 %v541_v41, %v518_v14  ;;  %v667_v24 = vmul.f32 %v659_v13, %v651_v2 }
  0xdf   : > { %v633_v25 = vadd.f32 %v632_v15, %v631_v5  ;;  %v668_v31 = vmul.f32 %v660_v19, %v652_v3  ;;  %v670_v38 = vmul.f32 %v662_v20, %v654_v4  ;;  %v664_v40 = vmul.f32 %v656_v17, %v648_v57 }
  0xe0   : > { %v530_v27 = vadd.f32 %v529_v16, %v528_v6  ;;  %v645_v29 = vadd.f32 %v644_v18, %v643_v7  ;;  %v565_v39 = vmax.f32 %v557_v22, 0.0  ;;  %v893_v44 = vrot.slane %v665_v21, 7  ;;  %v685_v7 = vpop.permute.xlu2 %684 }
  0xe1   : > { %v653_v32 = vadd.f32 %v633_v25, %v541_v41  ;;  %v895_v0 = vrot.slane %v666_v30, 6  ;;  %v897_v48 = vrot.slane %v667_v24, 5  ;;  %v899_v51 = vrot.slane %v668_v31, 4 }
  0xe2   : > { %v531_v33 = vrot.slane %v530_v27, 1  ;;  %v646_v37 = vrot.slane %v645_v29, 1  ;;  %v894_v49 = vsel %vm461_vm2, %v893_v44, %v664_v40  ;;  %v552_v52 = vadd.f32 %v1685_v28, %v1680_v12 }
  0xe3   : > { %v661_v45 = vmax.f32 %v653_v32, 0.0  ;;  %v553_v41 = vadd.f32 %v537_v34, %v1690_v35  ;;  %v903_v58 = vrot.slane %v670_v38, 2  ;;  %v896_v59 = vsel %vm463_vm3, %v895_v0, %v894_v49 }
  0xe4   : > { %v532_v46 = vadd.f32 %v531_v33, %v530_v27  ;;  %v647_v47 = vadd.f32 %v646_v37, %v645_v29  ;;  %v554_v60 = vadd.f32 %v538_v36, %v497_v9  ;;  %v555_v12 = vadd.f32 %v539_v50, %v1678_v8 }
  0xe5   : > { %v669_v55 = vmul.f32 %v661_v45, %v653_v32  ;;  %v556_v34 = vadd.f32 %v540_v53, %v1683_v26  ;;  %v898_v61 = vsel %vm465_vm4, %v897_v48, %v896_v59  ;;  %v560_v2 = vmax.f32 %v552_v52, 0.0 }
  0xe6   : > { %v559_v56 = vadd.f32 %v543_v42, %v532_v46  ;;  %v655_v57 = vadd.f32 %v647_v47, %v543_v42  ;;  %v558_v42 = vadd.f32 %v542_v54, %v1696_v43  ;;  %v900_v63 = vsel %vm722_vm7, %v899_v51, %v898_v61  ;;  %v692_v54 = vpop.permute.xlu1 %691 }
  0xe7   : > { %v901_v35 = vrot.slane %v669_v55, 3  ;;  %v561_v36 = vmax.f32 %v553_v41, 0.0  ;;  %v562_v3 = vmax.f32 %v554_v60, 0.0  ;;  %v563_v50 = vmax.f32 %v555_v12, 0.0 }
  0xe8   : > { %v663_v23 = vmax.f32 %v655_v57, 0.0  ;;  %v564_v62 = vmax.f32 %v556_v34, 0.0  ;;  %v573_v5 = vmul.f32 %v565_v39, %v557_v22  ;;  %v566_v53 = vmax.f32 %v558_v42, 0.0  ;;  %v699_v33 = vpop.permute.xlu2 %698 }
  0xe9   : > { %v902_v8 = vsel %vm725_vm8, %v901_v35, %v900_v63  ;;  %v567_v6 = vmax.f32 %v559_v56, 0.0  ;;  %v569_v10 = vmul.f32 %v561_v36, %v553_v41  ;;  %v570_v28 = vmul.f32 %v562_v3, %v554_v60  ;;  %v769_v35 = vpop.permute.xlu0 %768 }
  0xea   : > { %v671_v4 = vmul.f32 %v663_v23, %v655_v57  ;;  %v904_v26 = vsel %vm728_vm9, %v903_v58, %v902_v8  ;;  %v571_v43 = vmul.f32 %v563_v50, %v555_v12  ;;  %v568_v11 = vmul.f32 %v560_v2, %v552_v52 }
  0xeb   : > { %v572_v13 = vmul.f32 %v564_v62, %v556_v34  ;;  %v575_v15 = vmul.f32 %v567_v6, %v559_v56  ;;  %v715_v16 = vrot.slane %v569_v10, 7  ;;  %v717_v18 = vrot.slane %v570_v28, 6 }
  0xec   : > { %v905_v9 = vrot.slane %v671_v4, 1  ;;  %v574_v17 = vmul.f32 %v566_v53, %v558_v42  ;;  %v724_v19 = vrot.slane %v573_v5, 3  ;;  %v719_v21 = vrot.slane %v571_v43, 5 }
  0xed   : > { %v716_v20 = vsel %vm461_vm2, %v715_v16, %v568_v11  ;;  %v721_v25 = vrot.slane %v572_v13, 4  ;;  %v730_v29 = vrot.slane %v575_v15, 1  ;;  %v770_v4 = vrot.slane %v769_v35, 1 }
  0xee   : > { %v1743_v14 = vsel %vm731_vm10, %v905_v9, %v904_v26  ;;  %v718_v22 = vsel %vm463_vm3, %v717_v18, %v716_v20  ;;  %v727_v24 = vrot.slane %v574_v17, 2  ;;  %v706_v44 = vpop.permute.xlu1 %705  ;;  %v771_v50 = vrot.slane %v769_v35, 2 }
  0xef   : > { %v720_v27 = vsel %vm465_vm4, %v719_v21, %v718_v22  ;;  %v1757_v6 = vadd.s32 8, %v1584_v1 }
  0xf0   : > { %v723_v30 = vsel %vm722_vm7, %v721_v25, %v720_v27 }
  0xf1   : > { %v726_v31 = vsel %vm725_vm8, %v724_v19, %v723_v30  ;;  %1294 = vset.pattern.permute.xlu1 %v1757_v6 }
  0xf2   : > { %v729_v32 = vsel %vm728_vm9, %v727_v24, %v726_v31 }
  0xf3   : > { %v732_v37 = vsel %vm731_vm10, %v730_v29, %v729_v32 }
  0xf4   : > { %v734_v38 = vmul.f32 %v732_v37, %v685_v7  ;;  %v735_v39 = vmul.f32 %v732_v37, %v692_v54  ;;  %v736_v40 = vmul.f32 %v732_v37, %v699_v33  ;;  %v737_v0 = vmul.f32 %v732_v37, %v706_v44 }
  0xf5   : > { %v772_v7 = vrot.slane %v769_v35, 3 }
  0xf6   : > { %v738_v45 = vsel %vm307_vm0, %v734_v38, 0.0  ;;  %v745_v46 = vsel %vm307_vm0, %v735_v39, 0.0  ;;  %v752_v47 = vsel %vm307_vm0, %v736_v40, 0.0  ;;  %v759_v52 = vsel %vm307_vm0, %v737_v0, 0.0 }
  0xf7   : > { %v739_v48 = vrot.slane %v738_v45, 4  ;;  %v746_v49 = vrot.slane %v745_v46, 4  ;;  %v753_v51 = vrot.slane %v752_v47, 4  ;;  %v760_v41 = vrot.slane %v759_v52, 4 }
  0xf9   : > { %v740_v55 = vadd.f32 %v739_v48, %v738_v45  ;;  %v747_v56 = vadd.f32 %v746_v49, %v745_v46  ;;  %v754_v57 = vadd.f32 %v753_v51, %v752_v47  ;;  %v761_v58 = vadd.f32 %v760_v41, %v759_v52 }
  0xfb   : > { %v741_v59 = vrot.slane %v740_v55, 2  ;;  %v748_v60 = vrot.slane %v747_v56, 2  ;;  %v755_v12 = vrot.slane %v754_v57, 2  ;;  %v762_v34 = vrot.slane %v761_v58, 2 }
  0xfd   : > { %v742_v23 = vadd.f32 %v741_v59, %v740_v55  ;;  %v749_v61 = vadd.f32 %v748_v60, %v747_v56  ;;  %v756_v42 = vadd.f32 %v755_v12, %v754_v57  ;;  %v763_v63 = vadd.f32 %v762_v34, %v761_v58 }
  0xff   : > { %v743_v2 = vrot.slane %v742_v23, 1  ;;  %v750_v36 = vrot.slane %v749_v61, 1  ;;  %v757_v3 = vrot.slane %v756_v42, 1  ;;  %v764_v8 = vrot.slane %v763_v63, 1 }
 0x101   : > { %v744_v62 = vadd.f32 %v743_v2, %v742_v23  ;;  %v751_v5 = vadd.f32 %v750_v36, %v749_v61  ;;  %v758_v26 = vadd.f32 %v757_v3, %v756_v42  ;;  %v765_v53 = vadd.f32 %v764_v8, %v763_v63 }
 0x103   : > { %v777_v9 = vadd.f32 %v769_v35, %v744_v62  ;;  %v778_v10 = vadd.f32 %v770_v4, %v751_v5  ;;  %v779_v28 = vadd.f32 %v771_v50, %v758_v26  ;;  %v780_v13 = vadd.f32 %v772_v7, %v765_v53  ;;  %v863_v4 = vpop.permute.xlu2 %862  ;;  %v870_v53 = vpop.permute.xlu1 %869 }
 0x104   : > { %v908_v8 = vmul.f32 %v1743_v14, %v863_v4 }
 0x105   : > { %v1218_v43 = vmul.f32 -1.442695, %v777_v9  ;;  %v1219_v54 = vmul.f32 -1.442695, %v778_v10  ;;  %v1220_v11 = vmul.f32 -1.442695, %v779_v28  ;;  %v909_v28 = vmul.f32 %v1743_v14, %v870_v53 }
 0x106   : > { %v1221_v15 = vmul.f32 -1.442695, %v780_v13  ;;  %v912_v5 = vsel %vm307_vm0, %v908_v8, 0.0 }
 0x107   : > { %1301 = vpow2.f32 %v1218_v43  ;;  %v913_v9 = vrot.slane %v912_v5, 4 }
 0x108   : > { %1303 = vpow2.f32 %v1219_v54 }
 0x109   : > { %1305 = vpow2.f32 %v1220_v11  ;;  %v914_v54 = vadd.f32 %v913_v9, %v912_v5  ;;  %v919_v11 = vsel %vm307_vm0, %v909_v28, 0.0 }
 0x10a   : > { %1307 = vpow2.f32 %v1221_v15 }
 0x10b   : > { %v915_v15 = vrot.slane %v914_v54, 2 }
 0x10d   : > { %v1302_v16 = vpop.eup %1301 }
 0x10e   : > { %v1304_v18 = vpop.eup %1303  ;;  %v793_v17 = vadd.f32 1.0, %v1302_v16  ;;  %v920_v16 = vrot.slane %v919_v11, 4 }
 0x10f   : > { %v1306_v19 = vpop.eup %1305  ;;  %v794_v20 = vadd.f32 1.0, %v1304_v18  ;;  %v916_v18 = vadd.f32 %v915_v15, %v914_v54 }
 0x110   : > { %1309 = vrcp.f32 %v793_v17  ;;  %v795_v21 = vadd.f32 1.0, %v1306_v19  ;;  %v1308_v22 = vpop.eup %1307  ;;  %v806_v32 = vand.u32 2147483647, %v793_v17  ;;  %v808_v37 = vand.u32 2147483648, %v793_v17 }
 0x111   : > { %1311 = vrcp.f32 %v794_v20  ;;  %v1760_v27 = vadd.f32 1.0, %v1308_v22  ;;  %vm802_vm12 = vweird.f32 %v793_v17  ;;  %vm817_vm2 = vweird.f32 %v794_v20  ;;  %v943_v22 = vpop.permute.xlu1 %942 }
 0x112   : > { %1313 = vrcp.f32 %v795_v21  ;;  %vm807_vm13 = vcmp.eq.f32.partialorder %v806_v32, 8.507059e+37  ;;  %v809_v46 = vor.u32 1.1754944e-38, %v808_v37  ;;  %v836_v47 = vand.u32 2147483647, %v795_v21 }
 0x113   : > { %1315 = vrcp.f32 %v1760_v27  ;;  %v838_v48 = vand.u32 2147483648, %v795_v21  ;;  %v823_v56 = vand.u32 2147483648, %v794_v20  ;;  %vm832_vm3 = vweird.f32 %v795_v21 }
 0x114   : > { %v821_v59 = vand.u32 2147483647, %v794_v20  ;;  %vm837_vm6 = vcmp.eq.f32.partialorder %v836_v47, 8.507059e+37  ;;  %v853_v62 = vand.u32 2147483648, %v1760_v27  ;;  %vm847_vm9 = vweird.f32 %v1760_v27 }
 0x115   : > { %v839_v60 = vor.u32 1.1754944e-38, %v838_v48  ;;  %v824_v61 = vor.u32 1.1754944e-38, %v823_v56  ;;  %v851_v26 = vand.u32 2147483647, %v1760_v27  ;;  %v917_v19 = vrot.slane %v916_v18, 1 }
 0x116   : > { %v1310_v25 = vpop.eup %1309  ;;  %vm822_vm7 = vcmp.eq.f32.partialorder %v821_v59, 8.507059e+37  ;;  %v854_v10 = vor.u32 1.1754944e-38, %v853_v62 }
 0x117   : > { %v1312_v29 = vpop.eup %1311  ;;  %v798_v30 = vmul.f32 %v1310_v25, %v793_v17  ;;  %vm803_vm11 = vweird.f32 %v1310_v25  ;;  %v921_v17 = vadd.f32 %v920_v16, %v919_v11 }
 0x118   : > { %v813_v24 = vmul.f32 %v1312_v29, %v794_v20  ;;  %v1314_v33 = vpop.eup %1313  ;;  %vm804_vm14 = vmor %vm802_vm12, %vm803_vm11  ;;  %vm818_vm15 = vweird.f32 %v1312_v29  ;;  %vm852_vm11 = vcmp.eq.f32.partialorder %v851_v26, 8.507059e+37  ;;  %v884_v20 = vpop.permute.xlu2 %883 }
 0x119   : > { %v799_v31 = vsub.f32 1.0, %v798_v30  ;;  %v828_v40 = vmul.f32 %v1314_v33, %v795_v21  ;;  %vm833_vm1 = vweird.f32 %v1314_v33  ;;  %v1316_v41 = vpop.eup %1315  ;;  %vm819_vm4 = vmor %vm817_vm2, %vm818_vm15  ;;  %v911_v32 = vmul.f32 %v1743_v14, %v884_v20  ;;  %v1333_v20 = vld [vmem:[%s1577_s16] sm:$0xff] }
 0x11a   : > { %v814_v38 = vsub.f32 1.0, %v813_v24  ;;  %vm834_vm5 = vmor %vm832_vm3, %vm833_vm1  ;;  %v843_v35 = vmul.f32 %v1316_v41, %v1760_v27  ;;  %vm848_vm8 = vweird.f32 %v1316_v41  ;;  %v918_v27 = vadd.f32 %v917_v19, %v916_v18 }
 0x11b   : > { %v800_v39 = vmul.f32 %v1310_v25, %v799_v31  ;;  %v829_v45 = vsub.f32 1.0, %v828_v40  ;;  %vm849_vm10 = vmor %vm847_vm9, %vm848_vm8 }
 0x11c   : > { %v815_v44 = vmul.f32 %v1312_v29, %v814_v38  ;;  %v844_v2 = vsub.f32 1.0, %v843_v35 }
 0x11d   : > { %v801_v0 = vadd.f32 %v1310_v25, %v800_v39  ;;  %v830_v51 = vmul.f32 %v1314_v33, %v829_v45 }
 0x11e   : > { %v816_v52 = vadd.f32 %v1312_v29, %v815_v44  ;;  %v845_v3 = vmul.f32 %v1316_v41, %v844_v2  ;;  %v933_v44 = vsel %vm307_vm0, %v911_v32, 0.0 }
 0x11f   : > { %v805_v49 = vsel %vm804_vm14, %v1310_v25, %v801_v0  ;;  %v831_v58 = vadd.f32 %v1314_v33, %v830_v51  ;;  %v934_v45 = vrot.slane %v933_v44, 4 }
 0x120   : > { %v810_v55 = vsel %vm807_vm13, %v809_v46, %v805_v49  ;;  %v820_v34 = vsel %vm819_vm4, %v1312_v29, %v816_v52  ;;  %v846_v50 = vadd.f32 %v1316_v41, %v845_v3  ;;  %v945_v29 = vperm.slane %v943_v22, 0 }
 0x121   : > { %v1044_v57 = vperm.slane %v810_v55, 0  ;;  %v835_v12 = vsel %vm834_vm5, %v1314_v33, %v831_v58  ;;  %v825_v63 = vsel %vm822_vm7, %v824_v61, %v820_v34  ;;  %v949_v33 = vpop.permute.xlu2 %948  ;;  %v935_v48 = vadd.f32 %v934_v45, %v933_v44 }
 0x122   : > { %v840_v23 = vsel %vm837_vm6, %v839_v60, %v835_v12  ;;  %v1057_v36 = vperm.slane %v825_v63, 0  ;;  %v850_v7 = vsel %vm849_vm10, %v1316_v41, %v846_v50  ;;  %v964_v24 = vadd.f32 %v945_v29, %v918_v27 }
 0x123   : > { %1055 = vperm.xlu1 %1294, %v1044_v57   ;;  %1049 = vperm.xlu2 %1293, %v1044_v57   ;;  %v1070_v42 = vperm.slane %v840_v23, 0  ;;  %v855_v43 = vsel %vm852_vm11, %v854_v10, %v850_v7  ;;  %v951_v40 = vperm.slane %v949_v33, 0  ;;  %v936_v41 = vrot.slane %v935_v48, 2 }
 0x124   : > { %v1083_v13 = vperm.slane %v855_v43, 0  ;;  %v1222_v38 = vmul.f32 -1.442695, %v964_v24 }
 0x125   : > { %1075 = vperm.xlu0 %1295, %v1070_v42   ;;  %v937_v57 = vadd.f32 %v936_v41, %v935_v48 }
 0x126   : > { %1317 = vpow2.f32 %v1222_v38 }
 0x127   : > { %v938_v12 = vrot.slane %v937_v57, 1 }
 0x12b   : > { %1068 = vperm.xlu1 %1294, %v1057_v36   ;;  %1062 = vperm.xlu2 %1293, %v1057_v36  }
 0x12c   : > { %v1318_v51 = vpop.eup %1317 }
 0x12d   : > { %1298 = vset.pattern.permute.xlu0 %v1757_v6  ;;  %v980_v55 = vadd.f32 1.0, %v1318_v51 }
 0x12f   : > { %v995_v10 = vand.u32 2147483648, %v980_v55  ;;  %vm989_vm13 = vweird.f32 %v980_v55  ;;  %v993_v28 = vand.u32 2147483647, %v980_v55 }
 0x131   : > { %vm994_vm15 = vcmp.eq.f32.partialorder %v993_v28, 8.507059e+37 }
 0x133   : > { %1297 = vset.pattern.permute.xlu1 %v1584_v1  ;;  %1296 = vset.pattern.permute.xlu2 %v1757_v6  ;;  %v922_v1 = vrot.slane %v921_v17, 2  ;;  %v877_v6 = vpop.permute.xlu0 %876 }
 0x134   : > { %v910_v21 = vmul.f32 %v1743_v14, %v877_v6  ;;  %v955_v14 = vpop.permute.xlu1 %954 }
 0x135   : > { %v923_v25 = vadd.f32 %v922_v1, %v921_v17  ;;  %v957_v58 = vperm.slane %v955_v14, 0 }
 0x136   : > { %v926_v30 = vsel %vm307_vm0, %v910_v21, 0.0 }
 0x137   : > { %v924_v31 = vrot.slane %v923_v25, 1  ;;  %v927_v37 = vrot.slane %v926_v30, 4 }
 0x139   : > { %v925_v39 = vadd.f32 %v924_v31, %v923_v25  ;;  %v928_v0 = vadd.f32 %v927_v37, %v926_v30  ;;  %v1334_v37 = vld [vmem:[%s1577_s16 + $0x10] sm:$0xff] }
 0x13b   : > { %1088 = vperm.xlu1 %1297, %v1083_v13   ;;  %1081 = vperm.xlu2 %1296, %v1070_v42   ;;  %v965_v46 = vadd.f32 %v951_v40, %v925_v39  ;;  %v929_v47 = vrot.slane %v928_v0, 2  ;;  %v961_v23 = vpop.permute.xlu0 %960  ;;  %v939_v42 = vadd.f32 %v938_v12, %v937_v57 }
 0x13c   : > { %v963_v63 = vperm.slane %v961_v23, 0 }
 0x13d   : > { %v1223_v49 = vmul.f32 -1.442695, %v965_v46  ;;  %v930_v52 = vadd.f32 %v929_v47, %v928_v0 }
 0x13e   : > { %v967_v3 = vadd.f32 %v963_v63, %v939_v42  ;;  %v1337_v63 = vld [vmem:[%s1577_s16 + $0x20] sm:$0xff] }
 0x13f   : > { %1319 = vpow2.f32 %v1223_v49  ;;  %v931_v56 = vrot.slane %v930_v52, 1 }
 0x140   : > { %1321 = vrcp.f32 %v980_v55  ;;  %v1225_v50 = vmul.f32 -1.442695, %v967_v3 }
 0x141   : > { %v932_v60 = vadd.f32 %v931_v56, %v930_v52 }
 0x143   : > { %1094 = vperm.xlu2 %1296, %v1083_v13   ;;  %v966_v34 = vadd.f32 %v957_v58, %v932_v60  ;;  %v996_v13 = vor.u32 1.1754944e-38, %v995_v10  ;;  %v1335_v58 = vld [vmem:[%s1577_s16 + $0x8] sm:$0xff]  ;;  %v1340_v10 = vld [vmem:[%s1577_s16 + $0x30] sm:$0xff] }
 0x144   : > { %v1336_v60 = vld [vmem:[%s1577_s16 + $0x28] sm:$0xff] }
 0x145   : > { %v1320_v59 = vpop.eup %1319  ;;  %v1224_v2 = vmul.f32 -1.442695, %v966_v34 }
 0x146   : > { %v981_v35 = vadd.f32 1.0, %v1320_v59  ;;  %v1322_v61 = vpop.eup %1321 }
 0x147   : > { %v985_v36 = vmul.f32 %v1322_v61, %v980_v55  ;;  %vm990_vm12 = vweird.f32 %v1322_v61 }
 0x148   : > { %1323 = vrcp.f32 %v981_v35  ;;  %vm991_vm14 = vmor %vm989_vm13, %vm990_vm12  ;;  %v1010_v19 = vand.u32 2147483648, %v981_v35  ;;  %vm1004_vm2 = vweird.f32 %v981_v35  ;;  %v1008_v22 = vand.u32 2147483647, %v981_v35 }
 0x149   : > { %1325 = vpow2.f32 %v1224_v2  ;;  %v986_v4 = vsub.f32 1.0, %v985_v36 }
 0x14a   : > { %1327 = vpow2.f32 %v1225_v50  ;;  %v1011_v29 = vor.u32 1.1754944e-38, %v1010_v19  ;;  %vm1009_vm4 = vcmp.eq.f32.partialorder %v1008_v22, 8.507059e+37 }
 0x14b   : > { %v987_v5 = vmul.f32 %v1322_v61, %v986_v4 }
 0x14d   : > { %v988_v7 = vadd.f32 %v1322_v61, %v987_v5 }
 0x14e   : > { %v1324_v8 = vpop.eup %1323 }
 0x14f   : > { %v1326_v62 = vpop.eup %1325  ;;  %v1000_v26 = vmul.f32 %v1324_v8, %v981_v35  ;;  %v992_v54 = vsel %vm991_vm14, %v1322_v61, %v988_v7  ;;  %vm1005_vm1 = vweird.f32 %v1324_v8 }
 0x150   : > { %v982_v53 = vadd.f32 1.0, %v1326_v62  ;;  %v1328_v43 = vpop.eup %1327  ;;  %v997_v18 = vsel %vm994_vm15, %v996_v13, %v992_v54  ;;  %vm1006_vm3 = vmor %vm1004_vm2, %vm1005_vm1  ;;  %v1338_v62 = vld [vmem:[%s1577_s16 + $0x18] sm:$0xff] }
 0x151   : > { %v1001_v9 = vsub.f32 1.0, %v1000_v26  ;;  %v1778_v15 = vadd.f32 1.0, %v1328_v43  ;;  %v1339_v26 = vld [vmem:[%s1577_s16 + $0x38] sm:$0xff] }
 0x152   : > { %1329 = vrcp.f32 %v982_v53  ;;  %v1025_v45 = vand.u32 2147483648, %v982_v53  ;;  %vm1019_vm6 = vweird.f32 %v982_v53  ;;  %v1023_v46 = vand.u32 2147483647, %v982_v53 }
 0x153   : > { %v1002_v11 = vmul.f32 %v1324_v8, %v1001_v9  ;;  %1331 = vrcp.f32 %v1778_v15  ;;  %v1040_v57 = vand.u32 2147483648, %v1778_v15  ;;  %vm1034_vm10 = vweird.f32 %v1778_v15 }
 0x154   : > { %v1026_v49 = vor.u32 1.1754944e-38, %v1025_v45  ;;  %vm1024_vm8 = vcmp.eq.f32.partialorder %v1023_v46, 8.507059e+37  ;;  %v1038_v34 = vand.u32 2147483647, %v1778_v15 }
 0x155   : > { %v1003_v1 = vadd.f32 %v1324_v8, %v1002_v11  ;;  %v1041_v42 = vor.u32 1.1754944e-38, %v1040_v57 }
 0x156   : > { %vm1039_vm12 = vcmp.eq.f32.partialorder %v1038_v34, 8.507059e+37 }
 0x157   : > { %v1007_v25 = vsel %vm1006_vm3, %v1324_v8, %v1003_v1 }
 0x158   : > { %v1330_v6 = vpop.eup %1329  ;;  %v1012_v24 = vsel %vm1009_vm4, %v1011_v29, %v1007_v25 }
 0x159   : > { %v1015_v27 = vmul.f32 %v1330_v6, %v982_v53  ;;  %v1332_v33 = vpop.eup %1331  ;;  %vm1020_vm5 = vweird.f32 %v1330_v6 }
 0x15a   : > { %v1030_v40 = vmul.f32 %v1332_v33, %v1778_v15  ;;  %vm1021_vm7 = vmor %vm1019_vm6, %vm1020_vm5  ;;  %vm1035_vm9 = vweird.f32 %v1332_v33 }
 0x15b   : > { %v1016_v32 = vsub.f32 1.0, %v1015_v27  ;;  %vm1036_vm11 = vmor %vm1034_vm10, %vm1035_vm9 }
 0x15c   : > { %v1031_v0 = vsub.f32 1.0, %v1030_v40 }
 0x15d   : > { %v1017_v39 = vmul.f32 %v1330_v6, %v1016_v32 }
 0x15e   : > { %v1032_v48 = vmul.f32 %v1332_v33, %v1031_v0 }
 0x15f   : > { %v1018_v44 = vadd.f32 %v1330_v6, %v1017_v39 }
 0x160   : > { %v1033_v56 = vadd.f32 %v1332_v33, %v1032_v48 }
 0x161   : > { %v1022_v47 = vsel %vm1021_vm7, %v1330_v6, %v1018_v44 }
 0x162   : > { %v1027_v41 = vsel %vm1024_vm8, %v1026_v49, %v1022_v47  ;;  %v1037_v61 = vsel %vm1036_vm11, %v1332_v33, %v1033_v56 }
 0x163   : > { %v1042_v4 = vsel %vm1039_vm12, %v1041_v42, %v1037_v61 }
 0x17d   : > { %v1050_v16 = vpop.permute.xlu2 %1049 }
 0x17e   : > { %v1096_v17 = vmul.f32 %v1050_v16, %v997_v18 }
 0x180   : > { %v1104_v21 = vmul.f32 %v1333_v20, %v1096_v17 }
 0x182   : > { %1112 = vst.msk [vmem:[%s1784_s11] sm:$0xff] %vm307_vm0, %v1104_v21 }
 0x185   : > { %v1063_v30 = vpop.permute.xlu2 %1062 }
 0x186   : > { %v1098_v31 = vmul.f32 %v1063_v30, %v1012_v24 }
 0x188   : > { %v1106_v38 = vmul.f32 %v1334_v37, %v1098_v31 }
 0x18a   : > { %1114 = vst.msk [vmem:[%s1784_s11 + $0x10] sm:$0xff] %vm307_vm0, %v1106_v38 }
 0x195   : > { %v1056_v51 = vpop.permute.xlu1 %1055  ;;  %v1082_v52 = vpop.permute.xlu2 %1081 }
 0x196   : > { %v1097_v55 = vmul.f32 %v1056_v51, %v997_v18  ;;  %v1101_v14 = vmul.f32 %v1082_v52, %v1027_v41 }
 0x197   : > { %v1076_v35 = vpop.permute.xlu0 %1075 }
 0x198   : > { %v1105_v59 = vmul.f32 %v1335_v58, %v1097_v55  ;;  %v1109_v12 = vmul.f32 %v1336_v60, %v1101_v14  ;;  %v1100_v23 = vmul.f32 %v1076_v35, %v1027_v41 }
 0x19a   : > { %1113 = vst.msk [vmem:[%s1784_s11 + $0x8] sm:$0xff] %vm307_vm0, %v1105_v59  ;;  %v1108_v2 = vmul.f32 %v1337_v63, %v1100_v23 }
 0x19b   : > { %1117 = vst.msk [vmem:[%s1784_s11 + $0x28] sm:$0xff] %vm307_vm0, %v1109_v12 }
 0x19c   : > { %1116 = vst.msk [vmem:[%s1784_s11 + $0x20] sm:$0xff] %vm307_vm0, %v1108_v2 }
 0x19d   : > { %v1069_v36 = vpop.permute.xlu1 %1068  ;;  %v1095_v3 = vpop.permute.xlu2 %1094 }
 0x19e   : > { %v1099_v8 = vmul.f32 %v1069_v36, %v1012_v24  ;;  %v1103_v50 = vmul.f32 %v1095_v3, %v1042_v4 }
 0x1a0   : > { %v1107_v5 = vmul.f32 %v1338_v62, %v1099_v8  ;;  %v1111_v53 = vmul.f32 %v1339_v26, %v1103_v50 }
 0x1a2   : > { %1115 = vst.msk [vmem:[%s1784_s11 + $0x18] sm:$0xff] %vm307_vm0, %v1107_v5 }
 0x1a3   : > { %1119 = vst.msk [vmem:[%s1784_s11 + $0x38] sm:$0xff] %vm307_vm0, %v1111_v53 }
 0x1ad   : > { %v1089_v7 = vpop.permute.xlu1 %1088 }
 0x1ae   : > { %v1102_v9 = vmul.f32 %v1089_v7, %v1042_v4 }
 0x1b0   : > { %v1110_v28 = vmul.f32 %v1340_v10, %v1102_v9 }
 0x1b2   : > { %1118 = vst.msk [vmem:[%s1784_s11 + $0x30] sm:$0xff] %vm307_vm0, %v1110_v28 }
 0x1b3   : > { %1398 = shalt.err (!%p1395_p4)
}
 0x1b4   : > { %s1443_s22 = smov 128   ;;  %s1444_s16 = smov 8  }
 0x1b5   : > { %1235 = dma.vmem_to_hbm [thread:$0]  (%p1535_p11), %s1134_s20, 1024, %s1136_s9, %s1121_s12, %s1443_s22, %s1443_s22, %s1444_s16  }
 0x1b6 PF: > { %s1150_s11 = sand.u32 1, %s1425_s24   ;;  %p1861_p7 = scmp.ge.s32.totalorder %s1437_s27, 2 }
 0x1b7   : > { %s1151_s18 = scalar_lea.sflag [#allocation4], %s1150_s11 }
 0x1b8   : > { %p1242_p5 = pnand %p1861_p7, %p1539_p12 }
 0x1ba   : > { %p1243_p8 = pneg %p1242_p5 }
 0x1bc   : > { %1420 = dma.done.wait (%p1243_p8), %s1151_s18, 1024  }
 0x1bd   : > { %1422 = vsyncadd (%p1243_p8), %s1151_s18, 4294966272  ;;  %s1862_s19 = sld [smem:[#allocation8_spill]]  ;;  %p20_p10 = scmp.ge.s32.totalorder %s1510_s30, 4  }
 0x1be   : > { %s1863_s24 = smov %s1429_s25  ;;  %s1864_s25 = smov %s1433_s26 }
 0x1bf   : > { %s1866_s27 = smov %s1510_s30  ;;  %22 = sbr.rel (!%p20_p10) target bundleno = 5 (0x5), region = 93 }
 0x1c3   : > { %s1865_s26 = smov %s1862_s19 }
 0x1c4   :  { %1157 = vsyncpa [#allocation3], 1 }
 0x1c5   :  { %1159 = vsyncpa [#allocation3 + $0x1], 1 }
 0x1c6   :  { %1160 = vsyncpa [#allocation4], 1 }
 0x1c7   :  { %1162 = vsyncpa [#allocation4 + $0x1], 1 }

</bundles_post_ra>
